<compile_context>
chip_gen: v5e
topology: v5e:2x2
jax: 0.10.0
libtpu: 0.0.40
codegen_flags: <defaults>
</compile_context>

<pallas_src>
import jax
import jax.numpy as jnp
from jax.experimental import pallas as pl
from jax.experimental.pallas import tpu as pltpu


def _round_up(x, m):
    return (x + m - 1) // m * m


def _patch_embed_kernel(x_ref, w_ref, b_ref, o_ref):
    # x_ref: [TM, Kp]  tile of flattened patches (K zero-padded to 128-multiple)
    # w_ref: [Kp, Ep]  whole (padded) projection matrix, resident every step
    # b_ref: [1,  Ep]  bias row (padded)
    # o_ref: [TM, Ep]
    acc = jnp.dot(x_ref[...], w_ref[...], preferred_element_type=jnp.float32)
    o_ref[...] = (acc + b_ref[...]).astype(o_ref.dtype)


def patch_embed_forward(x, weight, bias, patch_size, *, tm=4096, use_bf16=False):
    """x: [N, C, H, W] (NCHW), weight: [E, C, ph, pw], bias: [E].

    Returns [N, E, Hp, Wp] (same as the PyTorch module).
    Set use_bf16=True to halve HBM traffic on the GEMM inputs (f32 accumulate
    is kept either way).
    """
    ph, pw = patch_size
    N, C, H, W = x.shape
    E = weight.shape[0]

    # F.pad semantics from the reference forward: pad W on the right, H on the bottom.
    if W % pw != 0:
        x = jnp.pad(x, ((0, 0), (0, 0), (0, 0), (0, pw - W % pw)))
    if H % ph != 0:
        x = jnp.pad(x, ((0, 0), (0, 0), (0, ph - H % ph), (0, 0)))
    H_pad, W_pad = x.shape[2], x.shape[3]
    Hp, Wp = H_pad // ph, W_pad // pw

    # Extract non-overlapping patches; flatten each in (C, kh, kw) order to
    # match the PyTorch OIHW conv-weight layout.
    xp = x.reshape(N, C, Hp, ph, Wp, pw)
    xp = xp.transpose(0, 2, 4, 1, 3, 5)              # [N, Hp, Wp, C, ph, pw]
    xp = xp.reshape(N * Hp * Wp, C * ph * pw)        # [M, K]

    M, K = xp.shape

    # Lane-dense padding: K (contraction) and E (output lanes) to 128-multiples.
    K_pad = _round_up(K, 128)
    E_pad = _round_up(E, 128)

    w_flat = weight.reshape(E, K).T                  # [K, E]
    if K_pad != K or E_pad != E:
        w_flat = jnp.pad(w_flat, ((0, K_pad - K), (0, E_pad - E)))
    b_row = jnp.pad(bias, (0, E_pad - E)).reshape(1, E_pad)
    if K_pad != K:
        xp = jnp.pad(xp, ((0, 0), (0, K_pad - K)))

    # Tile M; keep TM a multiple of 8 and pad M up to a whole number of tiles.
    tm_eff = min(tm, _round_up(M, 8))
    M_pad = _round_up(M, tm_eff)
    if M_pad != M:
        xp = jnp.pad(xp, ((0, M_pad - M), (0, 0)))
    grid_m = M_pad // tm_eff

    compute_dtype = jnp.bfloat16 if use_bf16 else xp.dtype
    xp_c = xp.astype(compute_dtype)
    w_c = w_flat.astype(compute_dtype)

    cost = pl.CostEstimate(
        flops=2 * M_pad * K_pad * E_pad,
        bytes_accessed=(M_pad * K_pad + K_pad * E_pad + M_pad * E_pad) * 4,
        transcendentals=0,
    )

    out = pl.pallas_call(
        _patch_embed_kernel,
        out_shape=jax.ShapeDtypeStruct((M_pad, E_pad), x.dtype),
        grid_spec=pltpu.PrefetchScalarGridSpec(
            num_scalar_prefetch=0,
            grid=(grid_m,),
            in_specs=[
                pl.BlockSpec((tm_eff, K_pad), lambda i: (i, 0)),
                pl.BlockSpec((K_pad, E_pad), lambda i: (0, 0)),
                pl.BlockSpec((1, E_pad), lambda i: (0, 0)),
            ],
            out_specs=pl.BlockSpec((tm_eff, E_pad), lambda i: (i, 0)),
        ),
        compiler_params=pltpu.CompilerParams(
            dimension_semantics=("parallel",)),
        cost_estimate=cost,
    )(xp_c, w_c, b_row)

    # Slice off M/E padding, back to the PyTorch conv output layout [N, E, Hp, Wp].
    out = out[:M, :E].reshape(N, Hp, Wp, E).transpose(0, 3, 1, 2)
    return out


def _reference(x, weight, bias, patch_size):
    ph, pw = patch_size
    H, W = x.shape[2], x.shape[3]
    if W % pw != 0:
        x = jnp.pad(x, ((0, 0), (0, 0), (0, 0), (0, pw - W % pw)))
    if H % ph != 0:
        x = jnp.pad(x, ((0, 0), (0, 0), (0, ph - H % ph), (0, 0)))
    out = jax.lax.conv_general_dilated(
        x, weight, window_strides=patch_size, padding="VALID",
        dimension_numbers=("NCHW", "OIHW", "NCHW"))
    return out + bias.reshape(1, -1, 1, 1)


if __name__ == "__main__":
    # Module config (defaults): patch_size=4, in_chans=3, embed_dim=96, norm=None
    patch_size = (4, 4)
    in_chans = 3
    embed_dim = 96

    key = jax.random.PRNGKey(0)
    kx, kw, kb, kx2 = jax.random.split(key, 4)

    # Deterministic parameter init (Conv2d weight [E, C, p, p], bias [E]).
    fan_in = in_chans * patch_size[0] * patch_size[1]
    bound = 1.0 / (fan_in ** 0.5)
    weight = jax.random.uniform(
        kw, (embed_dim, in_chans, patch_size[0], patch_size[1]),
        minval=-bound, maxval=bound, dtype=jnp.float32)
    bias = jax.random.uniform(
        kb, (embed_dim,), minval=-bound, maxval=bound, dtype=jnp.float32)

    # Case 1: evenly divisible spatial dims. [N=2, C=3, H=16, W=16]
    x = jax.random.normal(kx, (2, in_chans, 16, 16), dtype=jnp.float32)
    out = jax.block_until_ready(patch_embed_forward(x, weight, bias, patch_size))
    ref = _reference(x, weight, bias, patch_size)
    assert out.shape == (2, embed_dim, 4, 4), out.shape
    assert jnp.allclose(out, ref, atol=1e-4, rtol=1e-4)

    # Case 2: uneven spatial dims exercise the F.pad branch. [N=2, C=3, H=15, W=17]
    x2 = jax.random.normal(kx2, (2, in_chans, 15, 17), dtype=jnp.float32)
    out2 = jax.block_until_ready(patch_embed_forward(x2, weight, bias, patch_size))
    ref2 = _reference(x2, weight, bias, patch_size)
    assert out2.shape == (2, embed_dim, 4, 5), out2.shape
    assert jnp.allclose(out2, ref2, atol=1e-4, rtol=1e-4)

    print("KERNEL_OK")
</pallas_src>

<mosaic_0001>
module attributes {stable_mosaic.version = 11 : i64} {
  func.func @_patch_embed_kernel(%arg0: i32, %arg1: memref<32x128xf32, #tpu.memory_space<vmem>>, %arg2: memref<128x128xf32, #tpu.memory_space<vmem>>, %arg3: memref<1x128xf32, #tpu.memory_space<vmem>>, %arg4: memref<32x128xf32, #tpu.memory_space<vmem>>) attributes {dimension_semantics = [#tpu.dimension_semantics<parallel>], iteration_bounds = array<i64: 1>, scalar_prefetch = 0 : i64, scratch_operands = 0 : i64, tpu.core_type = #tpu.core_type<tc>, window_params = [{transform_indices = @transform_0, window_bounds = array<i64: 32, 128>}, {pipeline_mode = #tpu.pipeline_mode<synchronous>, transform_indices = @transform_1, window_bounds = array<i64: 128, 128>}, {pipeline_mode = #tpu.pipeline_mode<synchronous>, transform_indices = @transform_2, window_bounds = array<i64: 1, 128>}, {transform_indices = @transform_3, window_bounds = array<i64: 32, 128>}]} {
    %c0 = arith.constant 0 : index
    %c0_0 = arith.constant 0 : index
    %0 = vector.load %arg1[%c0, %c0_0] : memref<32x128xf32, #tpu.memory_space<vmem>>, vector<32x128xf32>
    %c0_1 = arith.constant 0 : index
    %c0_2 = arith.constant 0 : index
    %1 = vector.load %arg2[%c0_1, %c0_2] : memref<128x128xf32, #tpu.memory_space<vmem>>, vector<128x128xf32>
    %cst = arith.constant dense<0.000000e+00> : vector<32x128xf32>
    %2 = tpu.matmul %0, %1, %cst {dimension_numbers = #tpu.dot_dimension_numbers<[1], [0], [0], [1], [0, 0, 1, 1], [], []>} : vector<32x128xf32>, vector<128x128xf32>, vector<32x128xf32> -> vector<32x128xf32>
    %c0_3 = arith.constant 0 : index
    %c0_4 = arith.constant 0 : index
    %3 = vector.load %arg3[%c0_3, %c0_4] : memref<1x128xf32, #tpu.memory_space<vmem>>, vector<1x128xf32>
    %4 = vector.broadcast %3 : vector<1x128xf32> to vector<32x128xf32>
    %5 = arith.addf %2, %4 : vector<32x128xf32>
    %c0_5 = arith.constant 0 : index
    %c0_6 = arith.constant 0 : index
    %6 = vector.load %arg4[%c0_5, %c0_6] : memref<32x128xf32, #tpu.memory_space<vmem>>, vector<32x128xf32>
    tpu.vector_store %arg4[%c0_5, %c0_6], %5 {strides = array<i32>} : memref<32x128xf32, #tpu.memory_space<vmem>>, vector<32x128xf32>,
    return
  }
  func.func @transform_0(%arg0: i32) -> (i32, i32) {
    %c0_i32 = arith.constant 0 : i32
    %c0_i32_0 = arith.constant 0 : i32
    return %arg0, %c0_i32 : i32, i32
  }
  func.func @transform_1(%arg0: i32) -> (i32, i32) {
    %c0_i32 = arith.constant 0 : i32
    %c0_i32_0 = arith.constant 0 : i32
    %c0_i32_1 = arith.constant 0 : i32
    return %c0_i32, %c0_i32_0 : i32, i32
  }
  func.func @transform_2(%arg0: i32) -> (i32, i32) {
    %c0_i32 = arith.constant 0 : i32
    %c0_i32_0 = arith.constant 0 : i32
    %c0_i32_1 = arith.constant 0 : i32
    return %c0_i32, %c0_i32_0 : i32, i32
  }
  func.func @transform_3(%arg0: i32) -> (i32, i32) {
    %c0_i32 = arith.constant 0 : i32
    %c0_i32_0 = arith.constant 0 : i32
    return %arg0, %c0_i32 : i32, i32
  }
}

</mosaic_0001>

<bundles_post_ra>
// kernel: tpu_custom_call.1
= control target key start
LH: loop header
LB: loop body
LE: loop exit
PB: predicated region body
PF: predicated region fallthrough
CT: control target
= control target key end

     0   :  { %8 = vsyncpa [#allocation3], 0  ;;  %s302_s0 = inlined_call_operand.hbm [shape: f32[32,128], index: 0, kind: input, shape index: {}]   ;;  %s303_s1 = inlined_call_operand.hbm [shape: f32[128,128], index: 1, kind: input, shape index: {}]   ;;  %s304_s2 = inlined_call_operand.vmem [shape: f32[1,128], index: 2, kind: input, shape index: {}]   ;;  %s305_s3 = inlined_call_operand.hbm [shape: f32[32,128], index: 3, kind: output, shape index: {}]  }
   0x1   :  { %9 = vsyncpa [#allocation6], 0 }
   0x2   :  { %10 = vsyncpa [#allocation4], 0  ;;  %s15_s14 = sshll.u32 %s302_s0, 4  ;;  %s256_s15 = smov [#allocation2]   ;;  %s16_s14 = int_to_ptr.hbm [resolvable:$true] %s15_s14 }
   0x3   :  { %s17_s16 = sshll.u32 %s256_s15, 4  ;;  %s28_s19 = sshll.u32 %s303_s1, 4  ;;  %s18_s16 = int_to_ptr.vmem [resolvable:$true] %s17_s16  ;;  %s29_s19 = int_to_ptr.hbm [resolvable:$true] %s28_s19 }
   0x4   :  { %s257_s20 = smov 128   ;;  %s258_s21 = smov 8  }
   0x5   :  { %23 = dma.hbm_to_vmem [thread:$0]  %s16_s14, 512, %s18_s16, [#allocation3], %s257_s20, %s257_s20, %s258_s21  }
   0x6   :  { %s259_s22 = smov [#allocation5]  }
   0x7   :  { %s30_s23 = sshll.u32 %s259_s22, 4  ;;  %s31_s23 = int_to_ptr.vmem [resolvable:$true] %s30_s23 }
   0x8   :  { %36 = dma.hbm_to_vmem [thread:$0]  %s29_s19, 2048, %s31_s23, [#allocation6], %s257_s20, %s257_s20, %s258_s21  }
   0x9   :  { %250 = dma.done.wait [#allocation3], 512  }
   0xa   :  { %251 = vsyncadd [#allocation3], 4294966784 }
   0xb   :  { %252 = dma.done.wait [#allocation6], 2048  }
   0xc   :  { %253 = vsyncadd [#allocation6], 4294965248  ;;  %v66_v0 = vld [vmem:[#allocation5 + $0x78] sm:$0xff]  ;;  %v65_v1 = vld [vmem:[#allocation5 + $0x70] sm:$0xff]  ;;  %s260_s24 = smov [#allocation7]   ;;  %s110_s28 = sshll.u32 %s305_s3, 4  ;;  %s111_s28 = int_to_ptr.hbm [resolvable:$true] %s110_s28 }
   0xd   :  { %125 = vmatpush.msra.mxu2 %v66_v0  ;;  %126 = vmatpush.msra.mxu3 %v66_v0  ;;  %v64_v2 = vld [vmem:[#allocation5 + $0x68] sm:$0xff]  ;;  %v63_v3 = vld [vmem:[#allocation5 + $0x60] sm:$0xff]  ;;  %v62_v4 = vld [vmem:[#allocation5 + $0x58] sm:$0xff]  ;;  %s108_s25 = sshll.u32 %s260_s24, 4  ;;  %s109_s25 = int_to_ptr.vmem [resolvable:$true] %s108_s25 }
   0xe   :  { %71 = vmatpush.msra.mxu0 %v66_v0  ;;  %124 = vmatpush.msra.mxu1 %v66_v0  ;;  %v61_v5 = vld [vmem:[#allocation5 + $0x50] sm:$0xff]  ;;  %v60_v6 = vld [vmem:[#allocation5 + $0x48] sm:$0xff]  ;;  %v59_v7 = vld [vmem:[#allocation5 + $0x40] sm:$0xff] }
   0xf   :  { %128 = vmatpush.msra.mxu2 %v65_v1  ;;  %129 = vmatpush.msra.mxu3 %v65_v1  ;;  %v58_v8 = vld [vmem:[#allocation5 + $0x38] sm:$0xff]  ;;  %v57_v9 = vld [vmem:[#allocation5 + $0x30] sm:$0xff]  ;;  %v56_v10 = vld [vmem:[#allocation5 + $0x28] sm:$0xff] }
  0x10   :  { %72 = vmatpush.msra.mxu0 %v65_v1  ;;  %127 = vmatpush.msra.mxu1 %v65_v1  ;;  %v55_v11 = vld [vmem:[#allocation5 + $0x20] sm:$0xff]  ;;  %v54_v12 = vld [vmem:[#allocation5 + $0x18] sm:$0xff]  ;;  %v53_v13 = vld [vmem:[#allocation5 + $0x10] sm:$0xff] }
  0x11   :  { %131 = vmatpush.msra.mxu2 %v64_v2  ;;  %132 = vmatpush.msra.mxu3 %v64_v2  ;;  %v52_v14 = vld [vmem:[#allocation5 + $0x8] sm:$0xff]  ;;  %v51_v15 = vld [vmem:[#allocation5] sm:$0xff]  ;;  %v49_v16 = vld [vmem:[#allocation2 + $0x10] sm:$0xff] }
  0x12   :  { %73 = vmatpush.msra.mxu0 %v64_v2  ;;  %130 = vmatpush.msra.mxu1 %v64_v2  ;;  %v50_v17 = vld [vmem:[#allocation2 + $0x18] sm:$0xff]  ;;  %v47_v18 = vld [vmem:[#allocation2] sm:$0xff]  ;;  %v48_v19 = vld [vmem:[#allocation2 + $0x8] sm:$0xff] }
  0x13   :  { %134 = vmatpush.msra.mxu2 %v63_v3  ;;  %135 = vmatpush.msra.mxu3 %v63_v3  ;;  %v177_v20 = vld [vmem:[%s304_s2] ss:$0 sm:$0xff] }
  0x14   :  { %74 = vmatpush.msra.mxu0 %v63_v3  ;;  %133 = vmatpush.msra.mxu1 %v63_v3 }
  0x15   :  { %137 = vmatpush.msra.mxu2 %v62_v4  ;;  %138 = vmatpush.msra.mxu3 %v62_v4 }
  0x16   :  { %75 = vmatpush.msra.mxu0 %v62_v4  ;;  %136 = vmatpush.msra.mxu1 %v62_v4 }
  0x17   :  { %140 = vmatpush.msra.mxu2 %v61_v5  ;;  %141 = vmatpush.msra.mxu3 %v61_v5 }
  0x18   :  { %76 = vmatpush.msra.mxu0 %v61_v5  ;;  %139 = vmatpush.msra.mxu1 %v61_v5 }
  0x19   :  { %143 = vmatpush.msra.mxu2 %v60_v6  ;;  %144 = vmatpush.msra.mxu3 %v60_v6 }
  0x1a   :  { %77 = vmatpush.msra.mxu0 %v60_v6  ;;  %142 = vmatpush.msra.mxu1 %v60_v6 }
  0x1b   :  { %146 = vmatpush.msra.mxu2 %v59_v7  ;;  %147 = vmatpush.msra.mxu3 %v59_v7 }
  0x1c   :  { %78 = vmatpush.msra.mxu0 %v59_v7  ;;  %145 = vmatpush.msra.mxu1 %v59_v7 }
  0x1d   :  { %149 = vmatpush.msra.mxu2 %v58_v8  ;;  %150 = vmatpush.msra.mxu3 %v58_v8 }
  0x1e   :  { %79 = vmatpush.msra.mxu0 %v58_v8  ;;  %148 = vmatpush.msra.mxu1 %v58_v8 }
  0x1f   :  { %152 = vmatpush.msra.mxu2 %v57_v9  ;;  %153 = vmatpush.msra.mxu3 %v57_v9 }
  0x20   :  { %80 = vmatpush.msra.mxu0 %v57_v9  ;;  %151 = vmatpush.msra.mxu1 %v57_v9 }
  0x21   :  { %155 = vmatpush.msra.mxu2 %v56_v10  ;;  %156 = vmatpush.msra.mxu3 %v56_v10 }
  0x22   :  { %81 = vmatpush.msra.mxu0 %v56_v10  ;;  %154 = vmatpush.msra.mxu1 %v56_v10 }
  0x23   :  { %158 = vmatpush.msra.mxu2 %v55_v11  ;;  %159 = vmatpush.msra.mxu3 %v55_v11 }
  0x24   :  { %82 = vmatpush.msra.mxu0 %v55_v11  ;;  %157 = vmatpush.msra.mxu1 %v55_v11 }
  0x25   :  { %161 = vmatpush.msra.mxu2 %v54_v12  ;;  %162 = vmatpush.msra.mxu3 %v54_v12 }
  0x26   :  { %83 = vmatpush.msra.mxu0 %v54_v12  ;;  %160 = vmatpush.msra.mxu1 %v54_v12 }
  0x27   :  { %164 = vmatpush.msra.mxu2 %v53_v13  ;;  %165 = vmatpush.msra.mxu3 %v53_v13 }
  0x28   :  { %84 = vmatpush.msra.mxu0 %v53_v13  ;;  %163 = vmatpush.msra.mxu1 %v53_v13 }
  0x29   :  { %167 = vmatpush.msra.mxu2 %v52_v14  ;;  %168 = vmatpush.msra.mxu3 %v52_v14 }
  0x2a   :  { %85 = vmatpush.msra.mxu0 %v52_v14  ;;  %166 = vmatpush.msra.mxu1 %v52_v14 }
  0x2b   :  { %170 = vmatpush.msra.mxu2 %v51_v15  ;;  %171 = vmatpush.msra.mxu3 %v51_v15 }
  0x2c   :  { %93 = vmatmul.f32.vlgmr.msra.gmra.mxu2 %v49_v16  ;;  %96 = vmatmul.f32.vlgmr.msra.gmra.mxu3 %v50_v17 }
  0x2d   :  { %86 = vmatpush.msra.mxu0 %v51_v15  ;;  %169 = vmatpush.msra.mxu1 %v51_v15 }
  0x2e   :  { %87 = vmatmul.f32.vlgmr.msra.gmra.mxu0 %v47_v18  ;;  %90 = vmatmul.f32.vlgmr.msra.gmra.mxu1 %v48_v19 }
  0xab   :  { %v88_v21 = vpop.f32.mrf.mxu0  ;;  %v91_v22 = vpop.f32.mrf.mxu1 }
  0xac   :  { %v89_v23 = vadd.f32 %v177_v20, %v88_v21  ;;  %v92_v24 = vadd.f32 %v177_v20, %v91_v22 }
  0xae   :  { %100 = vst [vmem:[#allocation7] sm:$0xff] %v89_v23 }
  0xaf   :  { %101 = vst [vmem:[#allocation7 + $0x8] sm:$0xff] %v92_v24  ;;  %v94_v25 = vpop.f32.mrf.mxu2  ;;  %v97_v26 = vpop.f32.mrf.mxu3 }
  0xb0   :  { %v95_v27 = vadd.f32 %v177_v20, %v94_v25  ;;  %v98_v28 = vadd.f32 %v177_v20, %v97_v26 }
  0xb2   :  { %102 = vst [vmem:[#allocation7 + $0x10] sm:$0xff] %v95_v27 }
  0xb3   :  { %103 = vst [vmem:[#allocation7 + $0x18] sm:$0xff] %v98_v28 }
  0xb4   :  { %116 = dma.vmem_to_hbm [thread:$0]  %s109_s25, 512, %s111_s28, [#allocation4], %s257_s20, %s257_s20, %s258_s21  }
  0xb5   :  { %254 = dma.done.wait [#allocation4], 512  }
  0xb6   :  { %255 = vsyncadd [#allocation4], 4294966784 }
  0xb7   :  { %121 = vsyncpa [#allocation3], 1 }
  0xb8   :  { %122 = vsyncpa [#allocation6], 1 }
  0xb9   :  { %123 = vsyncpa [#allocation4], 1 }

</bundles_post_ra>
